<compile_context>
chip_gen: v7x
topology: tpu7x:2x2x1
jax: 0.10.0
libtpu: 0.0.40
codegen_flags: <defaults>
</compile_context>

<pallas_src>
import jax
import jax.numpy as jnp
from jax.experimental import pallas as pl
from jax.experimental.pallas import tpu as pltpu


def _chomp_copy_kernel(x_ref, o_ref):
    # Identical block shapes -> pure tile copy, no slicing in the body.
    o_ref[...] = x_ref[...]


def _round_up(v: int, m: int) -> int:
    return ((v + m - 1) // m) * m


def _sublane_multiple(dtype) -> int:
    # Sub-32-bit dtypes pack along sublanes: keep row tiles aligned.
    itemsize = jnp.dtype(dtype).itemsize
    return {4: 8, 2: 16, 1: 32}.get(itemsize, 8)


# ~4 MiB per VMEM buffer per grid step (review: v6e/v7x sweet spot); with
# double-buffered in+out tiles that's ~16 MiB of VMEM working set.
_TILE_BYTES_TARGET = 4 * 1024 * 1024
_DEFAULT_ROW_TILE = 512
# Below this copy size (or when l_out < 128 lanes) the plain-JAX slice wins.
_SMALL_INPUT_BYTES = 4 * 1024 * 1024


def _chomp1d_pallas(x2d: jax.Array, l_out: int, *, tr=None, tl=None) -> jax.Array:
    """Tiled, double-buffered HBM->VMEM->HBM copy of x2d[:, :l_out]."""
    r, _l = x2d.shape
    dtype = x2d.dtype
    itemsize = jnp.dtype(dtype).itemsize
    sub = _sublane_multiple(dtype)

    # Row tile: default 512 rows (a multiple of every sublane packing),
    # clamped to the (sublane-aligned) problem size for small inputs.
    tr_eff = _DEFAULT_ROW_TILE if tr is None else tr
    tr_eff = max(sub, min(_round_up(tr_eff, sub), _round_up(r, sub)))

    # Time tile: dtype-aware so every dtype moves ~_TILE_BYTES_TARGET bytes per
    # buffer per step (f32 -> 2048, bf16 -> 4096, int8 -> 8192 at tr=512),
    # clamped to the 128-aligned output extent.
    if tl is None:
        tl_eff = max(128, (_TILE_BYTES_TARGET // (tr_eff * itemsize)) // 128 * 128)
    else:
        tl_eff = _round_up(max(tl, 128), 128)
    tl_eff = min(tl_eff, _round_up(l_out, 128))

    # Megacore (v7x, 2 TCs): make sure at least one "parallel" axis has >= 2
    # blocks when the tensor is big enough to split along time.
    if pl.cdiv(r, tr_eff) == 1 and pl.cdiv(l_out, tl_eff) == 1 and l_out > 128:
        tl_eff = max(128, _round_up(pl.cdiv(l_out, 2), 128))

    grid = (pl.cdiv(r, tr_eff), pl.cdiv(l_out, tl_eff))

    # Scoped VMEM: double-buffered input + output tiles plus slack, capped to
    # fit every generation's physical VMEM (v7x = 64 MiB).
    tile_bytes = tr_eff * tl_eff * itemsize
    vmem_limit = min(64 * 1024 * 1024,
                     max(16 * 1024 * 1024, 4 * tile_bytes + 2 * 1024 * 1024))

    out2d = pl.pallas_call(
        _chomp_copy_kernel,
        out_shape=jax.ShapeDtypeStruct((r, l_out), dtype),
        grid_spec=pltpu.PrefetchScalarGridSpec(
            num_scalar_prefetch=0,
            grid=grid,
            # Matching block shapes for in/out: only the kept L_out columns
            # (rounded up to the final 128-aligned tile) are DMA'd from HBM.
            in_specs=[pl.BlockSpec((tr_eff, tl_eff), lambda i, j: (i, j))],
            out_specs=pl.BlockSpec((tr_eff, tl_eff), lambda i, j: (i, j)),
        ),
        compiler_params=pltpu.CompilerParams(
            # Both axes independent -> shard across both TensorCores on v7x.
            dimension_semantics=("parallel", "parallel"),
            vmem_limit_bytes=vmem_limit,
        ),
        cost_estimate=pl.CostEstimate(
            flops=0,
            transcendentals=0,
            bytes_accessed=2 * r * l_out * itemsize,
        ),
    )(x2d)
    return out2d


def chomp1d(x: jax.Array, chomp_size: int, *, force_pallas: bool = False,
            tr=None, tl=None) -> jax.Array:
    """Chomp1d.forward for (N, C, L) inputs.

    Default behaviour: small copies (or l_out < 128 lanes) take the plain-JAX
    slice fast path (XLA fuses it away); larger copies run the tiled Pallas
    kernel. `force_pallas=True` always runs the kernel.
    """
    if chomp_size <= 0:
        # Matches the PyTorch module: `x` is returned unchanged when
        # chomp_size <= 0 (the module guards with `if self.chomp_size > 0`).
        return x

    n, c, l = x.shape
    l_out = l - chomp_size
    assert l_out > 0, "chomp_size must be smaller than the temporal length"

    r = n * c
    itemsize = jnp.dtype(x.dtype).itemsize

    if not force_pallas and (l_out < 128 or r * l_out * itemsize < _SMALL_INPUT_BYTES):
        # Tiny copy / sub-128-lane output: launching a kernel costs more than
        # it saves, and XLA fuses the slice into the consumer for free.
        return x[..., :l_out]

    x2d = x.reshape(r, l)
    out2d = _chomp1d_pallas(x2d, l_out, tr=tr, tl=tl)
    return out2d.reshape(n, c, l_out)


if __name__ == "__main__":
    key = jax.random.PRNGKey(0)
    N, C, L = 2, 4, 16
    chomp_size = 3

    x = jax.random.normal(key, (N, C, L), dtype=jnp.float32)

    # Exercise the Pallas copy kernel itself (force past the small-input fast
    # path so the kernel actually runs on this tiny example).
    y = chomp1d(x, chomp_size, force_pallas=True)
    jax.block_until_ready(y)

    # Reference check against plain-JAX slicing (same semantics as PyTorch).
    y_ref = x[..., :-chomp_size]
    assert y.shape == (N, C, L - chomp_size), y.shape
    assert y.dtype == x.dtype
    assert jnp.array_equal(y, y_ref), "mismatch vs reference slice"

    # Default path on a tiny input: takes the fused-XLA slice fast path.
    y_fast = chomp1d(x, chomp_size)
    assert jnp.array_equal(y_fast, y_ref)

    # chomp_size == 0 path (module returns x unchanged).
    y0 = chomp1d(x, 0)
    assert jnp.array_equal(y0, x)

    print("KERNEL_OK")
</pallas_src>

<mosaic_0001>
module attributes {stable_mosaic.version = 11 : i64} {
  func.func @_chomp_copy_kernel(%arg0: i32, %arg1: i32, %arg2: memref<8x128xf32, #tpu.memory_space<vmem>>, %arg3: memref<8x128xf32, #tpu.memory_space<vmem>>) attributes {dimension_semantics = [#tpu.dimension_semantics<parallel>, #tpu.dimension_semantics<parallel>], iteration_bounds = array<i64: 1, 1>, scalar_prefetch = 0 : i64, scratch_operands = 0 : i64, tpu.core_type = #tpu.core_type<tc>, window_params = [{transform_indices = @transform_0, window_bounds = array<i64: 8, 128>}, {transform_indices = @transform_1, window_bounds = array<i64: 8, 128>}]} {
    %c0 = arith.constant 0 : index
    %c0_0 = arith.constant 0 : index
    %0 = vector.load %arg2[%c0, %c0_0] : memref<8x128xf32, #tpu.memory_space<vmem>>, vector<8x128xf32>
    %c0_1 = arith.constant 0 : index
    %c0_2 = arith.constant 0 : index
    %1 = vector.load %arg3[%c0_1, %c0_2] : memref<8x128xf32, #tpu.memory_space<vmem>>, vector<8x128xf32>
    tpu.vector_store %arg3[%c0_1, %c0_2], %0 {strides = array<i32>} : memref<8x128xf32, #tpu.memory_space<vmem>>, vector<8x128xf32>,
    return
  }
  func.func @transform_0(%arg0: i32, %arg1: i32) -> (i32, i32) {
    %c0_i32 = arith.constant 0 : i32
    return %arg0, %arg1 : i32, i32
  }
  func.func @transform_1(%arg0: i32, %arg1: i32) -> (i32, i32) {
    %c0_i32 = arith.constant 0 : i32
    return %arg0, %arg1 : i32, i32
  }
}

</mosaic_0001>

<bundles_post_ra>
// kernel: tpu_custom_call.1
= control target key start
LH: loop header
LB: loop body
LE: loop exit
PB: predicated region body
PF: predicated region fallthrough
CT: control target
= control target key end

     0   :  { %6 = vsyncpa [#allocation3], 0  ;;  %s124_s0 = inlined_call_operand.hbm [shape: f32[8,16], index: 0, kind: input, shape index: {}]   ;;  %s125_s1 = inlined_call_operand.hbm [shape: f32[8,13], index: 1, kind: output, shape index: {}]  }
   0x1   :  { %7 = vsyncpa [#allocation4], 0  ;;  %s88_s6 = smov [#allocation2]   ;;  %s40_s10 = scalar_lea.hbm %s124_s0, 128 }
   0x2   :  { %s14_s7 = sshll.u32 %s88_s6, 4  ;;  %p41_p0 = scmp.ne.s32.totalorder %s124_s0, %s40_s10  ;;  %s15_s7 = int_to_ptr.vmem [resolvable:$true] %s14_s7 }
   0x3   :  { %p44_p1 = scmp.lt.u32.totalorder %s40_s10, %s124_s0 }
   0x5   :  { %p46_p2 = pnand %p44_p1, %p41_p0 }
   0x7   :  { %49 = shalt.err (!%p46_p2)
}
   0x8   :  { %s50_s15 = scalar_lea.vmem %s15_s7, 128  ;;  %p55_p4 = scmp.lt.s32.totalorder %s15_s7, %s15_s7 }
   0x9   :  { %p51_p3 = scmp.ne.s32.totalorder %s15_s7, %s50_s15  ;;  %p56_p5 = scmp.lt.s32.totalorder %s50_s15, %s50_s15 }
   0xb   :  { %p57_p6 = por %p56_p5, %p55_p4 }
   0xd   :  { %p58_p7 = pnand %p57_p6, %p51_p3 }
   0xf   :  { %61 = shalt.err (!%p58_p7)
}
  0x10   :  { %17 = dma.hbm_to_vmem [thread:$0]  %s124_s0, 128, %s15_s7, [#allocation3]  }
  0x11   :  { %84 = dma.done.wait [#allocation3], 128  }
  0x12   :  { %85 = vsyncadd [#allocation3], 4294967168  ;;  %s89_s18 = smov [#allocation5]   ;;  %v21_v0 = vld [vmem:[#allocation2] sm:$0xff] }
  0x13   :  { %s29_s19 = sshll.u32 %s89_s18, 4  ;;  %22 = vst [vmem:[#allocation5] sm:$0xff] %v21_v0  ;;  %s30_s19 = int_to_ptr.vmem [resolvable:$true] %s29_s19 }
  0x14   :  { %s62_s20 = scalar_lea.vmem %s30_s19, 128  ;;  %p67_p9 = scmp.lt.s32.totalorder %s30_s19, %s30_s19 }
  0x15   :  { %p63_p8 = scmp.ne.s32.totalorder %s30_s19, %s62_s20  ;;  %p68_p10 = scmp.lt.s32.totalorder %s62_s20, %s62_s20 }
  0x17   :  { %p69_p11 = por %p68_p10, %p67_p9 }
  0x19   :  { %p70_p12 = pnand %p69_p11, %p63_p8 }
  0x1b   :  { %73 = shalt.err (!%p70_p12)
}
  0x1c   :  { %s74_s23 = scalar_lea.hbm %s125_s1, 128 }
  0x1d   :  { %p75_p13 = scmp.ne.s32.totalorder %s125_s1, %s74_s23  ;;  %p78_p0 = scmp.lt.u32.totalorder %s74_s23, %s125_s1 }
  0x1f   :  { %p80_p1 = pnand %p78_p0, %p75_p13 }
  0x21   :  { %83 = shalt.err (!%p80_p1)
}
  0x22   :  { %32 = dma.vmem_to_hbm [thread:$0]  %s30_s19, 128, %s125_s1, [#allocation4]  }
  0x23   :  { %86 = dma.done.wait [#allocation4], 128  }
  0x24   :  { %87 = vsyncadd [#allocation4], 4294967168 }
  0x25   :  { %36 = vsyncpa [#allocation3], 1 }
  0x26   :  { %37 = vsyncpa [#allocation4], 1 }

</bundles_post_ra>
